<compile_context>
chip_gen: v7x
topology: tpu7x:2x2x1
jax: 0.10.0
libtpu: 0.0.40
codegen_flags: <defaults>
</compile_context>

<pallas_src>
import functools
import math

import jax
import jax.numpy as jnp
from jax.experimental import pallas as pl
from jax.experimental.pallas import tpu as pltpu

EPS = 1e-05
_LANE = 128
_SUBLANE = 8


def _round_up(x: int, m: int) -> int:
    return (x + m - 1) // m * m


def _cdiv(a: int, b: int) -> int:
    return (a + b - 1) // b


def _vmem_capacity_bytes() -> int:
    """Physical VMEM per TensorCore (128 MiB v5e/v6e, 64 MiB v7x)."""
    try:
        info = pltpu.get_tpu_info()
        cap = int(getattr(info, "vmem_capacity_bytes", 0) or 0)
        if cap > 0:
            return cap
    except Exception:
        pass
    return 64 << 20  # conservative default (v7x per-TC)


def _vmem_limit_bytes(per_step_block_bytes: int, vmem_cap: int) -> int:
    # in+out blocks are double-buffered by the pipeline; add headroom, and
    # leave ~13% of physical VMEM for Mosaic internal scratch/semaphores.
    needed = 2 * per_step_block_bytes + (2 << 20)
    ceiling = max(32 << 20, int(vmem_cap * 0.87))
    return int(min(max(needed, 32 << 20), ceiling))


# ----------------------------------------------------------------------------
# Single-pass kernel: one (Ct, N) slab per grid step, whole channels resident.
# Last dim is full-extent, so there is no lane garbage and no masking at all.
# Overhanging rows (C % Ct != 0) only produce garbage in their own rows, whose
# writes are out-of-bounds and dropped by Pallas.
# ----------------------------------------------------------------------------
def _norm_single_pass_kernel(x_ref, o_ref):
    x_nat = x_ref[...]                                       # (Ct, N) native dtype
    if x_ref.dtype == jnp.float32 or x_ref.dtype == jnp.bfloat16:
        x_red = x_nat                                        # packed bf16 reduction on v6e/v7x
    else:
        x_red = x_nat.astype(jnp.float32)
    mn = jnp.min(x_red, axis=-1, keepdims=True).astype(jnp.float32)
    mx = jnp.max(x_red, axis=-1, keepdims=True).astype(jnp.float32)
    inv = pl.reciprocal(mx - mn + EPS, approx=False)         # one per channel row
    x = x_nat.astype(jnp.float32)
    o_ref[...] = ((x - mn + EPS) * inv).astype(o_ref.dtype)


# ----------------------------------------------------------------------------
# Two-pass kernels (large channels): tiled min/max reduction into a packed
# lane-dense stats slab (min broadcast in lanes [0,128), max in [128,256)),
# then a fully parallel normalization pass.
# ----------------------------------------------------------------------------
def _minmax_kernel(x_ref, stats_ref, *, n_tile, tail_valid):
    j = pl.program_id(1)                                     # reduction axis (last)
    nj = pl.num_programs(1)
    half = stats_ref.shape[-1] // 2
    rows = stats_ref.shape[0]

    @pl.when(j == 0)
    def _():
        stats_ref[:, :half] = jnp.full((rows, half), jnp.inf, jnp.float32)
        stats_ref[:, half:] = jnp.full((rows, half), -jnp.inf, jnp.float32)

    def _update(tile_mn, tile_mx):
        stats_ref[:, :half] = jnp.minimum(stats_ref[:, :half], tile_mn)
        stats_ref[:, half:] = jnp.maximum(stats_ref[:, half:], tile_mx)

    x_nat = x_ref[...]                                       # (Ct, n_tile) native dtype
    if x_ref.dtype == jnp.float32 or x_ref.dtype == jnp.bfloat16:
        x_red = x_nat
    else:
        x_red = x_nat.astype(jnp.float32)

    if tail_valid == n_tile:
        # Every tile fully in-bounds: mask-free hot path.
        _update(jnp.min(x_red, axis=-1, keepdims=True).astype(jnp.float32),
                jnp.max(x_red, axis=-1, keepdims=True).astype(jnp.float32))
    else:
        @pl.when(j < nj - 1)
        def _():
            _update(jnp.min(x_red, axis=-1, keepdims=True).astype(jnp.float32),
                    jnp.max(x_red, axis=-1, keepdims=True).astype(jnp.float32))

        @pl.when(j == nj - 1)
        def _():
            xf = x_nat.astype(jnp.float32)
            col = jax.lax.broadcasted_iota(jnp.int32, xf.shape, 1)
            valid = col < tail_valid
            _update(jnp.min(jnp.where(valid, xf, jnp.inf), axis=-1, keepdims=True),
                    jnp.max(jnp.where(valid, xf, -jnp.inf), axis=-1, keepdims=True))


def _apply_kernel(x_ref, stats_ref, o_ref):
    half = stats_ref.shape[-1] // 2
    mn = stats_ref[:, 0:1]                                   # (Ct, 1) f32
    mx = stats_ref[:, half:half + 1]
    inv = pl.reciprocal(mx - mn + EPS, approx=False)
    x = x_ref[...].astype(jnp.float32)
    o_ref[...] = ((x - mn + EPS) * inv).astype(o_ref.dtype)


# ----------------------------------------------------------------------------
# Wrapper
# ----------------------------------------------------------------------------
def zero_one_normalization(x: jax.Array, *, force_two_pass: bool = False,
                           n_tile_override: int | None = None) -> jax.Array:
    """Per-channel (leading dim) 0-1 normalization, matching the PyTorch module."""
    orig_shape = x.shape
    C = int(orig_shape[0])
    N = int(math.prod(orig_shape[1:])) if len(orig_shape) > 1 else 1
    itemsize = jnp.dtype(x.dtype).itemsize
    row_bytes = max(N, 1) * itemsize

    xf = x.reshape(C, N)                                     # metadata-only reshape

    vmem_cap = _vmem_capacity_bytes()
    single_pass_budget = int(vmem_cap * 0.72)                # ~92 MiB @128, ~46 MiB @64

    ct_min = C if C < _SUBLANE else _SUBLANE
    use_single_pass = ((not force_two_pass) and
                       4 * ct_min * row_bytes <= single_pass_budget)

    if use_single_pass:
        if C <= _SUBLANE:
            ct = C                                           # full-extent channel block
        else:
            target = 12 << 20 if vmem_cap > (96 << 20) else 8 << 20
            ct_vmem = max(_SUBLANE,
                          ((single_pass_budget // (4 * row_bytes)) // _SUBLANE) * _SUBLANE)
            ct_tgt = max(_SUBLANE, (target // row_bytes) // _SUBLANE * _SUBLANE)
            ct_mc = max(_SUBLANE, _round_up(_cdiv(C, 2), _SUBLANE))  # >=2 blocks -> megacore
            ct = min(ct_vmem, ct_tgt, ct_mc, _round_up(C, _SUBLANE))
        num_c = _cdiv(C, ct)
        block_bytes = 2 * ct * N * itemsize                  # x block + out block per step
        out = pl.pallas_call(
            _norm_single_pass_kernel,
            out_shape=jax.ShapeDtypeStruct((C, N), x.dtype),
            grid=(num_c,),
            in_specs=[pl.BlockSpec((ct, N), lambda i: (i, 0))],
            out_specs=pl.BlockSpec((ct, N), lambda i: (i, 0)),
            compiler_params=pltpu.CompilerParams(
                dimension_semantics=("parallel",),
                vmem_limit_bytes=_vmem_limit_bytes(block_bytes, vmem_cap),
            ),
        )(xf)
    else:
        # Channel tile: multiple of 8 (or full extent), capped for megacore split.
        if C <= _SUBLANE:
            ct = C
        else:
            ct = min(64,
                     max(_SUBLANE, _round_up(_cdiv(C, 2), _SUBLANE)),
                     _round_up(C, _SUBLANE))
        # Lane tile: ~6-8 MiB x-block, bounded by double-buffered in+out VMEM.
        tile_budget = 8 << 20 if vmem_cap > (96 << 20) else 6 << 20
        vmem_ceiling = max(32 << 20, int(vmem_cap * 0.87))
        tile_budget = min(tile_budget, max(1 << 20, (vmem_ceiling - (4 << 20)) // 4))
        n_tile = max(_LANE, (tile_budget // (ct * itemsize)) // _LANE * _LANE)
        n_tile = min(n_tile, _round_up(N, _LANE))
        if n_tile_override is not None:
            n_tile = int(n_tile_override)                    # testing hook (mult of 128)
        num_c = _cdiv(C, ct)
        num_n = _cdiv(N, n_tile)
        tail_valid = N - (num_n - 1) * n_tile                # valid lanes in last tile

        stats_w = 2 * _LANE                                  # packed min|max, lane-dense

        # Pass 1: per-channel min/max, reduction axis last + "arbitrary".
        reduce_block_bytes = ct * n_tile * itemsize + ct * stats_w * 4
        stats = pl.pallas_call(
            functools.partial(_minmax_kernel, n_tile=n_tile, tail_valid=tail_valid),
            out_shape=jax.ShapeDtypeStruct((C, stats_w), jnp.float32),
            grid=(num_c, num_n),
            in_specs=[pl.BlockSpec((ct, n_tile), lambda i, j: (i, j))],
            out_specs=pl.BlockSpec((ct, stats_w), lambda i, j: (i, 0)),
            compiler_params=pltpu.CompilerParams(
                dimension_semantics=("parallel", "arbitrary"),
                vmem_limit_bytes=_vmem_limit_bytes(reduce_block_bytes, vmem_cap),
            ),
        )(xf)

        # Pass 2: fully parallel normalization (both TCs busy on v7x).
        apply_block_bytes = 2 * ct * n_tile * itemsize + ct * stats_w * 4
        out = pl.pallas_call(
            _apply_kernel,
            out_shape=jax.ShapeDtypeStruct((C, N), x.dtype),
            grid=(num_c, num_n),
            in_specs=[pl.BlockSpec((ct, n_tile), lambda i, j: (i, j)),
                      pl.BlockSpec((ct, stats_w), lambda i, j: (i, 0))],
            out_specs=pl.BlockSpec((ct, n_tile), lambda i, j: (i, j)),
            compiler_params=pltpu.CompilerParams(
                dimension_semantics=("parallel", "parallel"),
                vmem_limit_bytes=_vmem_limit_bytes(apply_block_bytes, vmem_cap),
            ),
        )(xf, stats)

    return out.reshape(orig_shape)


def zero_one_normalization_ref(x: jax.Array) -> jax.Array:
    """Pure-JAX reference mirroring the PyTorch forward."""
    C = x.shape[0]
    flat = x.reshape(C, -1)
    bshape = (C,) + (1,) * (x.ndim - 1)
    mn = flat.min(axis=1).reshape(bshape)
    mx = flat.max(axis=1).reshape(bshape)
    return (x - mn + EPS) / (mx - mn + EPS)


if __name__ == "__main__":
    key = jax.random.PRNGKey(0)

    # Primary CHW test shape (matches the PyTorch module's convention).
    C, H, W = 4, 16, 16
    x = jax.random.normal(key, (C, H, W), dtype=jnp.float32) * 3.0 + 1.0
    out = zero_one_normalization(x)
    jax.block_until_ready(out)
    ref = zero_one_normalization_ref(x)
    assert out.shape == (C, H, W)
    assert jnp.allclose(out, ref, rtol=1e-5, atol=1e-5), "single-pass mismatch"

    # Non-128-multiple spatial size, C < 8: full-extent blocks, no padding.
    x2 = jax.random.normal(jax.random.PRNGKey(1), (5, 10, 12), jnp.float32) * 2.0 - 0.5
    out2 = zero_one_normalization(x2)
    jax.block_until_ready(out2)
    assert jnp.allclose(out2, zero_one_normalization_ref(x2), rtol=1e-5, atol=1e-5), \
        "unaligned single-pass mismatch"

    # C > 8: channel grid of 2 blocks with row overhang on the last block.
    x3 = jax.random.normal(jax.random.PRNGKey(2), (12, 20, 30), jnp.float32) * 4.0
    out3 = zero_one_normalization(x3)
    jax.block_until_ready(out3)
    assert jnp.allclose(out3, zero_one_normalization_ref(x3), rtol=1e-5, atol=1e-5), \
        "channel-overhang single-pass mismatch"

    # Forced two-pass: multi-tile reduction (600 = 2*256 + 88 masked tail)
    # plus channel overhang.
    out4 = zero_one_normalization(x3, force_two_pass=True, n_tile_override=256)
    jax.block_until_ready(out4)
    assert jnp.allclose(out4, zero_one_normalization_ref(x3), rtol=1e-5, atol=1e-5), \
        "two-pass (masked tail) mismatch"

    out5 = zero_one_normalization(x2, force_two_pass=True)
    jax.block_until_ready(out5)
    assert jnp.allclose(out5, zero_one_normalization_ref(x2), rtol=1e-5, atol=1e-5), \
        "two-pass (single tile) mismatch"

    # bf16 path: native-dtype packed reduction, f32 normalize arithmetic.
    xb = x.astype(jnp.bfloat16)
    outb = zero_one_normalization(xb)
    jax.block_until_ready(outb)
    refb = zero_one_normalization_ref(xb).astype(jnp.float32)
    assert jnp.allclose(outb.astype(jnp.float32), refb, rtol=3e-2, atol=3e-2), \
        "bf16 mismatch"

    print("KERNEL_OK")
</pallas_src>

<mosaic_0001>
module attributes {stable_mosaic.version = 11 : i64} {
  func.func @_norm_single_pass_kernel(%arg0: i32, %arg1: memref<4x256xf32, #tpu.memory_space<vmem>>, %arg2: memref<4x256xf32, #tpu.memory_space<vmem>>) attributes {dimension_semantics = [#tpu.dimension_semantics<parallel>], iteration_bounds = array<i64: 1>, scalar_prefetch = 0 : i64, scratch_operands = 0 : i64, tpu.core_type = #tpu.core_type<tc>, window_params = [{transform_indices = @transform_0, window_bounds = array<i64: 4, 256>}, {transform_indices = @transform_1, window_bounds = array<i64: 4, 256>}]} {
    %c0 = arith.constant 0 : index
    %c0_0 = arith.constant 0 : index
    %0 = vector.load %arg1[%c0, %c0_0] : memref<4x256xf32, #tpu.memory_space<vmem>>, vector<4x256xf32>
    %cst = arith.constant dense<0x7F800000> : vector<4xf32>
    %1 = vector.multi_reduction <minimumf>, %0, %cst [1] : vector<4x256xf32> to vector<4xf32>
    %2 = vector.shape_cast %1 : vector<4xf32> to vector<4x1xf32>
    %cst_1 = arith.constant dense<0xFF800000> : vector<4xf32>
    %3 = vector.multi_reduction <maximumf>, %0, %cst_1 [1] : vector<4x256xf32> to vector<4xf32>
    %4 = vector.shape_cast %3 : vector<4xf32> to vector<4x1xf32>
    %5 = arith.subf %4, %2 : vector<4x1xf32>
    %cst_2 = arith.constant 9.99999974E-6 : f32
    %6 = vector.broadcast %cst_2 : f32 to vector<4x1xf32>
    %7 = arith.addf %5, %6 : vector<4x1xf32>
    %8 = tpu.reciprocal %7 : vector<4x1xf32> -> vector<4x1xf32>
    %9 = vector.broadcast %2 : vector<4x1xf32> to vector<4x256xf32>
    %10 = arith.subf %0, %9 : vector<4x256xf32>
    %cst_3 = arith.constant 9.99999974E-6 : f32
    %11 = vector.broadcast %cst_3 : f32 to vector<4x256xf32>
    %12 = arith.addf %10, %11 : vector<4x256xf32>
    %13 = vector.broadcast %8 : vector<4x1xf32> to vector<4x256xf32>
    %14 = arith.mulf %12, %13 : vector<4x256xf32>
    %c0_4 = arith.constant 0 : index
    %c0_5 = arith.constant 0 : index
    %15 = vector.load %arg2[%c0_4, %c0_5] : memref<4x256xf32, #tpu.memory_space<vmem>>, vector<4x256xf32>
    tpu.vector_store %arg2[%c0_4, %c0_5], %14 {strides = array<i32>} : memref<4x256xf32, #tpu.memory_space<vmem>>, vector<4x256xf32>,
    return
  }
  func.func @transform_0(%arg0: i32) -> (i32, i32) {
    %c0_i32 = arith.constant 0 : i32
    %c0_i32_0 = arith.constant 0 : i32
    return %arg0, %c0_i32 : i32, i32
  }
  func.func @transform_1(%arg0: i32) -> (i32, i32) {
    %c0_i32 = arith.constant 0 : i32
    %c0_i32_0 = arith.constant 0 : i32
    return %arg0, %c0_i32 : i32, i32
  }
}

</mosaic_0001>

<bundles_post_ra>
// kernel: tpu_custom_call.1
= control target key start
LH: loop header
LB: loop body
LE: loop exit
PB: predicated region body
PF: predicated region fallthrough
CT: control target
= control target key end

     0   :  { %6 = vsyncpa [#allocation3], 0  ;;  %s167_s0 = inlined_call_operand.hbm [shape: f32[4,256], index: 0, kind: input, shape index: {}]   ;;  %s168_s1 = inlined_call_operand.hbm [shape: f32[4,256], index: 1, kind: output, shape index: {}]  }
   0x1   :  { %7 = vsyncpa [#allocation4], 0  ;;  %s130_s6 = smov [#allocation2]   ;;  %s82_s10 = scalar_lea.hbm %s167_s0, 128 }
   0x2   :  { %s14_s7 = sshll.u32 %s130_s6, 4  ;;  %p83_p0 = scmp.ne.s32.totalorder %s167_s0, %s82_s10  ;;  %s15_s7 = int_to_ptr.vmem [resolvable:$true] %s14_s7 }
   0x3   :  { %p86_p1 = scmp.lt.u32.totalorder %s82_s10, %s167_s0 }
   0x5   :  { %p88_p2 = pnand %p86_p1, %p83_p0 }
   0x7   :  { %91 = shalt.err (!%p88_p2)
}
   0x8   :  { %s92_s15 = scalar_lea.vmem %s15_s7, 128  ;;  %p97_p4 = scmp.lt.s32.totalorder %s15_s7, %s15_s7 }
   0x9   :  { %p93_p3 = scmp.ne.s32.totalorder %s15_s7, %s92_s15  ;;  %p98_p5 = scmp.lt.s32.totalorder %s92_s15, %s92_s15 }
   0xb   :  { %p99_p6 = por %p98_p5, %p97_p4 }
   0xd   :  { %p100_p7 = pnand %p99_p6, %p93_p3 }
   0xf   :  { %103 = shalt.err (!%p100_p7)
}
  0x10   :  { %17 = dma.hbm_to_vmem [thread:$0]  %s167_s0, 128, %s15_s7, [#allocation3]  }
  0x11   :  { %126 = dma.done.wait [#allocation3], 128  }
  0x12   :  { %127 = vsyncadd [#allocation3], 4294967168  ;;  %vm25_vm0 = vcmask 1043456   ;;  %v21_v0 = vld [vmem:[#allocation2] sm:$0xff]  ;;  %v131_v8 = vmov 839922192   ;;  %v43_v10 = vlaneseq }
  0x13   :  { %v23_v1 = vcombine.high %v21_v0, %v21_v0  ;;  %v26_v2 = vsel %vm25_vm0, %v21_v0, inf  ;;  %v31_v4 = vsel %vm25_vm0, %v21_v0, -inf  ;;  %v41_v9 = vunpack.c.l.s4 %v131_v8  ;;  %s132_s0 = smov [#allocation5]  }
  0x14   :  { %v44_v13 = vshrl.u32 %v43_v10, 7  ;;  %s67_s18 = sshll.u32 %s132_s0, 4  ;;  %s68_s18 = int_to_ptr.vmem [resolvable:$true] %s67_s18 }
  0x15   :  { %v27_v3 = vsel %vm25_vm0, %v23_v1, inf  ;;  %v32_v5 = vsel %vm25_vm0, %v23_v1, -inf  ;;  %v42_v12 = vunpack.c.0.s8 %v41_v9  ;;  %s104_s19 = scalar_lea.vmem %s68_s18, 128  ;;  %p109_p9 = scmp.lt.s32.totalorder %s68_s18, %s68_s18 }
  0x16   :  { %v28_v6 = vmin.f32 %v26_v2, %v27_v3  ;;  %v33_v7 = vmax.f32 %v31_v4, %v32_v5  ;;  %p105_p8 = scmp.ne.s32.totalorder %s68_s18, %s104_s19  ;;  %p110_p10 = scmp.lt.s32.totalorder %s104_s19, %s104_s19 }
  0x17   :  { %v45_v17 = vsub.s32 %v42_v12, %v44_v13 }
  0x18   :  { %29 = vmin.xlane.f32.xlu0 %v28_v6  ;;  %p111_p11 = por %p110_p10, %p109_p9 }
  0x1a   :  { %p112_p12 = pnand %p111_p11, %p105_p8 }
  0x1c   :  { %34 = vmax.xlane.f32.xlu0 %v33_v7 }
  0xa5   :  { %v30_v11 = vpop.xlane.xlu0 %29 }
  0xa6   :  { %v46_v18 = vrot.slane %v30_v11, %v45_v17 }
  0xa8   :  { %v48_v19 = vsub.f32 %v21_v0, %v46_v18 }
  0xa9   :  { %v35_v14 = vpop.xlane.xlu0 %34 }
  0xaa   :  { %v36_v15 = vsub.f32 %v35_v14, %v30_v11  ;;  %v49_v21 = vadd.f32 1e-05, %v48_v19 }
  0xac   :  { %v37_v16 = vadd.f32 1e-05, %v36_v15 }
  0xae   :  { %80 = vrcp.f32 %v37_v16 }
  0xb8   :  { %v81_v20 = vpop.eup %80 }
  0xb9   :  { %v57_v22 = vrot.slane %v81_v20, %v45_v17 }
  0xbb   :  { %v59_v23 = vmul.f32 %v57_v22, %v49_v21 }
  0xbd   :  { %60 = vst [vmem:[#allocation5] sm:$0xff] %v59_v23 }
  0xbe   :  { %115 = shalt.err (!%p112_p12)
}
  0xbf   :  { %s116_s22 = scalar_lea.hbm %s168_s1, 128 }
  0xc0   :  { %p117_p13 = scmp.ne.s32.totalorder %s168_s1, %s116_s22  ;;  %p120_p0 = scmp.lt.u32.totalorder %s116_s22, %s168_s1 }
  0xc2   :  { %p122_p1 = pnand %p120_p0, %p117_p13 }
  0xc4   :  { %125 = shalt.err (!%p122_p1)
}
  0xc5   :  { %70 = dma.vmem_to_hbm [thread:$0]  %s68_s18, 128, %s168_s1, [#allocation4]  }
  0xc6   :  { %128 = dma.done.wait [#allocation4], 128  }
  0xc7   :  { %129 = vsyncadd [#allocation4], 4294967168 }
  0xc8   :  { %74 = vsyncpa [#allocation3], 1 }
  0xc9   :  { %75 = vsyncpa [#allocation4], 1 }

</bundles_post_ra>
